<compile_context>
chip_gen: v7x
topology: tpu7x:2x2x1
jax: 0.10.0
libtpu: 0.0.40
codegen_flags: <defaults>
</compile_context>

<pallas_src>
import functools

import jax
import jax.numpy as jnp
from jax.experimental import pallas as pl
from jax.experimental.pallas import tpu as pltpu

ALPHA = 0.25
GAMMA = 2.0

_LANES = 128


def _loss_sum_kernel(alpha, gamma, p_ref, t_ref, m_ref, out_ref, acc_ref):
    ti = pl.program_id(0)

    @pl.when(ti == 0)
    def _init():
        acc_ref[...] = jnp.zeros_like(acc_ref)

    # Native-dtype DMA, in-kernel cast (a VPU op hidden under the next DMA).
    y_p = p_ref[...].astype(jnp.float32)          # (TB, 128)
    y_t = t_ref[...].astype(jnp.float32)          # (TB, 128)
    m = m_ref[...].astype(jnp.float32)            # (TB, 128) of 0/1

    diff = (y_t - y_p) * m                        # masked residual
    err = jnp.abs(diff)
    sq = diff * diff
    if gamma == 2.0:
        focal = sq * err                          # |diff|**3, no pow / EUP
    else:
        # Generic-gamma fallback (guards pow(0, gamma) edge cases).
        focal = jnp.where(err > 0.0, jnp.power(err, gamma), 0.0) * err
    # Unselected / padded elements have err == 0, so they contribute 0 here.
    stress = (jnp.abs(y_t) + 1.0) * err

    # Fold alpha so a single accumulator / single output suffices.
    contrib = sq + alpha * (focal + stress)

    # Per-tile sublane collapse (XLU slot — idle in this all-VPU kernel) into a
    # tiny (1, 128) accumulator; the cross-lane collapse happens once below.
    acc_ref[...] += jnp.sum(contrib, axis=0, keepdims=True)

    @pl.when(ti == pl.num_programs(0) - 1)
    def _finish():
        out_ref[...] = jnp.sum(acc_ref[...], keepdims=True)   # (1, 1)


def _vmem_budget():
    """Return (vmem_limit_bytes, per-input block bytes) for this generation."""
    try:
        cap = int(pltpu.get_tpu_info().vmem_capacity_bytes)
    except Exception:                      # conservative fallback
        cap = 64 * 1024 * 1024
    if cap >= 100 * 1024 * 1024:           # v5e / v6e: 128 MiB physical VMEM
        return 96 * 1024 * 1024, 8 * 1024 * 1024
    return 48 * 1024 * 1024, 5 * 1024 * 1024   # v7x: 64 MiB per TensorCore


def _pick_row_tile(n_rows, itemsize, block_bytes):
    rows = max(8, block_bytes // (_LANES * itemsize))
    rows = (rows // 8) * 8                 # sublane-aligned
    n_rows_padded = ((n_rows + 7) // 8) * 8
    return max(8, min(rows, n_rows_padded))


def _to_slab(flat, total, dtype):
    """Flatten -> (optionally) zero-pad -> lane-dense (rows, 128) slab."""
    if flat.dtype != dtype:
        flat = flat.astype(dtype)
    pad = total - flat.shape[0]
    if pad:
        flat = jnp.pad(flat, (0, pad))     # zeros contribute 0 to every sum
    return flat.reshape(-1, _LANES)


def static_focal_stress_loss(y_pred, y_true, mask, alpha=ALPHA, gamma=GAMMA,
                             row_tile=None):
    """JAX/Pallas equivalent of StaticFocalStressLoss.forward (pprint=False)."""
    assert y_pred.ndim == 2 and y_pred.shape == y_true.shape
    b, c = y_pred.shape
    assert c % 3 == 0
    k = c // 3
    assert mask.shape == (b, k)

    # torch's mask.repeat(1, 3), done once in the wrapper as a narrow int8 op.
    mask3 = jnp.tile(mask.astype(jnp.int8), (1, 3))          # (B, 3K)

    n_elems = b * c
    n_rows = -(-n_elems // _LANES)                            # cdiv
    vmem_limit, block_bytes = _vmem_budget()
    tb = row_tile if row_tile is not None else _pick_row_tile(
        n_rows, y_pred.dtype.itemsize, block_bytes)
    assert tb >= 8 and tb % 8 == 0, "row_tile must be a positive multiple of 8"
    n_tiles = -(-n_rows // tb)
    total = n_tiles * tb * _LANES                             # padded extent

    p_slab = _to_slab(y_pred.reshape(-1), total, y_pred.dtype)
    t_slab = _to_slab(y_true.reshape(-1), total, y_true.dtype)
    m_slab = _to_slab(mask3.reshape(-1), total, jnp.int8)

    kernel = functools.partial(_loss_sum_kernel, float(alpha), float(gamma))
    data_spec = lambda: pl.BlockSpec((tb, _LANES), lambda i: (i, 0))

    partial_sum = pl.pallas_call(
        kernel,
        grid=(n_tiles,),
        in_specs=[data_spec(), data_spec(), data_spec()],
        out_specs=pl.BlockSpec((1, 1), lambda i: (0, 0)),
        out_shape=jax.ShapeDtypeStruct((1, 1), jnp.float32),
        scratch_shapes=[pltpu.VMEM((1, _LANES), jnp.float32)],
        compiler_params=pltpu.CompilerParams(
            dimension_semantics=("arbitrary",),
            vmem_limit_bytes=vmem_limit,
        ),
    )(p_slab, t_slab, m_slab)

    # Selected-element count = 3 * popcount(mask), computed in the wrapper.
    # NOTE: an all-False mask yields NaN, matching torch.mean over an empty set.
    n = 3.0 * jnp.sum(mask.astype(jnp.float32))
    return partial_sum[0, 0] / n


if __name__ == "__main__":
    def reference(y_pred, y_true, mask, alpha=ALPHA, gamma=GAMMA):
        m_rep = jnp.tile(mask, (1, 3)).astype(jnp.float32)
        n = jnp.sum(m_rep)
        diff = (y_true - y_pred) * m_rep
        err = jnp.abs(diff)
        return (jnp.sum(diff * diff) / n
                + alpha * (jnp.sum((err ** gamma) * err) / n
                           + jnp.sum((jnp.abs(y_true) + 1.0) * err) / n))

    # Case 1: tiny shapes, single (8, 128) tile with element padding.
    k1, k2, k3 = jax.random.split(jax.random.PRNGKey(0), 3)
    B, K = 2, 4                       # mask is (B, K); preds/targets are (B, 3K)
    y_pred = jax.random.normal(k1, (B, 3 * K), dtype=jnp.float32)
    y_true = jax.random.normal(k2, (B, 3 * K), dtype=jnp.float32)
    mask = jax.random.bernoulli(k3, p=0.6, shape=(B, K))

    loss = static_focal_stress_loss(y_pred, y_true, mask)
    jax.block_until_ready(loss)
    ref = reference(y_pred, y_true, mask)
    assert jnp.allclose(loss, ref, rtol=1e-5, atol=1e-5), (loss, ref)

    # Case 2: multi-tile grid + zero-padded tail (small row_tile override so the
    # sequential accumulation path is exercised at small shapes).
    k4, k5, k6 = jax.random.split(jax.random.PRNGKey(1), 3)
    B2, K2 = 96, 4                    # 96 * 12 = 1152 elems -> 9 rows of 128
    y_pred2 = jax.random.normal(k4, (B2, 3 * K2), dtype=jnp.float32)
    y_true2 = jax.random.normal(k5, (B2, 3 * K2), dtype=jnp.float32)
    mask2 = jax.random.bernoulli(k6, p=0.6, shape=(B2, K2))

    loss2 = static_focal_stress_loss(y_pred2, y_true2, mask2, row_tile=8)
    jax.block_until_ready(loss2)
    ref2 = reference(y_pred2, y_true2, mask2)
    assert jnp.allclose(loss2, ref2, rtol=1e-5, atol=1e-5), (loss2, ref2)

    print("KERNEL_OK")
</pallas_src>

<mosaic_0001>
module attributes {stable_mosaic.version = 11 : i64} {
  func.func @_loss_sum_kernel(%arg0: i32, %arg1: memref<8x128xf32, #tpu.memory_space<vmem>>, %arg2: memref<8x128xf32, #tpu.memory_space<vmem>>, %arg3: memref<8x128xi8, #tpu.memory_space<vmem>>, %arg4: memref<1x1xf32, #tpu.memory_space<vmem>>, %arg5: memref<1x128xf32, #tpu.memory_space<vmem>>) attributes {dimension_semantics = [#tpu.dimension_semantics<arbitrary>], iteration_bounds = array<i64: 1>, scalar_prefetch = 0 : i64, scratch_operands = 1 : i64, tpu.core_type = #tpu.core_type<tc>, window_params = [{transform_indices = @transform_0, window_bounds = array<i64: 8, 128>}, {transform_indices = @transform_1, window_bounds = array<i64: 8, 128>}, {transform_indices = @transform_2, window_bounds = array<i64: 8, 128>}, {pipeline_mode = #tpu.pipeline_mode<synchronous>, transform_indices = @transform_3, window_bounds = array<i64: 1, 1>}]} {
    %c0_i32 = arith.constant 0 : i32
    %0 = arith.cmpi eq, %arg0, %c0_i32 : i32
    %1 = arith.extui %0 : i1 to i32
    %c0_i32_0 = arith.constant 0 : i32
    %2 = arith.cmpi ne, %1, %c0_i32_0 : i32
    scf.if %2 {
      %cst_14 = arith.constant 0.000000e+00 : f32
      %28 = vector.broadcast %cst_14 : f32 to vector<1x128xf32>
      %c0_15 = arith.constant 0 : index
      %c0_16 = arith.constant 0 : index
      %29 = vector.load %arg5[%c0_15, %c0_16] : memref<1x128xf32, #tpu.memory_space<vmem>>, vector<1x128xf32>
      tpu.vector_store %arg5[%c0_15, %c0_16], %28 {strides = array<i32>} : memref<1x128xf32, #tpu.memory_space<vmem>>, vector<1x128xf32>,
    } else {
    }
    %c0 = arith.constant 0 : index
    %c0_1 = arith.constant 0 : index
    %3 = vector.load %arg1[%c0, %c0_1] : memref<8x128xf32, #tpu.memory_space<vmem>>, vector<8x128xf32>
    %c0_2 = arith.constant 0 : index
    %c0_3 = arith.constant 0 : index
    %4 = vector.load %arg2[%c0_2, %c0_3] : memref<8x128xf32, #tpu.memory_space<vmem>>, vector<8x128xf32>
    %c0_4 = arith.constant 0 : index
    %c0_5 = arith.constant 0 : index
    %5 = vector.load %arg3[%c0_4, %c0_5] : memref<8x128xi8, #tpu.memory_space<vmem>>, vector<8x128xi8>
    %6 = arith.sitofp %5 : vector<8x128xi8> to vector<8x128xf32>
    %7 = arith.subf %4, %3 : vector<8x128xf32>
    %8 = arith.mulf %7, %6 : vector<8x128xf32>
    %9 = math.absf %8 : vector<8x128xf32>
    %10 = arith.mulf %8, %8 : vector<8x128xf32>
    %11 = arith.mulf %10, %9 : vector<8x128xf32>
    %12 = math.absf %4 : vector<8x128xf32>
    %cst = arith.constant 1.000000e+00 : f32
    %13 = vector.broadcast %cst : f32 to vector<8x128xf32>
    %14 = arith.addf %12, %13 : vector<8x128xf32>
    %15 = arith.mulf %14, %9 : vector<8x128xf32>
    %16 = arith.addf %11, %15 : vector<8x128xf32>
    %cst_6 = arith.constant 2.500000e-01 : f32
    %17 = vector.broadcast %cst_6 : f32 to vector<8x128xf32>
    %18 = arith.mulf %17, %16 : vector<8x128xf32>
    %19 = arith.addf %10, %18 : vector<8x128xf32>
    %c0_7 = arith.constant 0 : index
    %c0_8 = arith.constant 0 : index
    %20 = vector.load %arg5[%c0_7, %c0_8] : memref<1x128xf32, #tpu.memory_space<vmem>>, vector<1x128xf32>
    %cst_9 = arith.constant dense<0.000000e+00> : vector<128xf32>
    %21 = vector.multi_reduction <add>, %19, %cst_9 [0] : vector<8x128xf32> to vector<128xf32>
    %22 = vector.shape_cast %21 : vector<128xf32> to vector<1x128xf32>
    %23 = arith.addf %20, %22 : vector<1x128xf32>
    %c0_10 = arith.constant 0 : index
    %c0_11 = arith.constant 0 : index
    %24 = vector.load %arg5[%c0_10, %c0_11] : memref<1x128xf32, #tpu.memory_space<vmem>>, vector<1x128xf32>
    tpu.vector_store %arg5[%c0_10, %c0_11], %23 {strides = array<i32>} : memref<1x128xf32, #tpu.memory_space<vmem>>, vector<1x128xf32>,
    %c0_i32_12 = arith.constant 0 : i32
    %25 = arith.cmpi eq, %arg0, %c0_i32_12 : i32
    %26 = arith.extui %25 : i1 to i32
    %c0_i32_13 = arith.constant 0 : i32
    %27 = arith.cmpi ne, %26, %c0_i32_13 : i32
    scf.if %27 {
      %c0_14 = arith.constant 0 : index
      %c0_15 = arith.constant 0 : index
      %28 = vector.load %arg5[%c0_14, %c0_15] : memref<1x128xf32, #tpu.memory_space<vmem>>, vector<1x128xf32>
      %29 = vector.shape_cast %28 : vector<1x128xf32> to vector<1x1x128xf32>
      %cst_16 = arith.constant dense<0.000000e+00> : vector<1xf32>
      %30 = vector.multi_reduction <add>, %29, %cst_16 [1, 2] : vector<1x1x128xf32> to vector<1xf32>
      %31 = vector.shape_cast %30 : vector<1xf32> to vector<1x1x1xf32>
      %32 = vector.extract %31[0, 0, 0] : f32 from vector<1x1x1xf32>
      %33 = vector.broadcast %32 : f32 to vector<1x1xf32>
      %c0_17 = arith.constant 0 : index
      %c0_18 = arith.constant 0 : index
      %34 = vector.load %arg4[%c0_17, %c0_18] : memref<1x1xf32, #tpu.memory_space<vmem>>, vector<1x1xf32>
      tpu.vector_store %arg4[%c0_17, %c0_18], %33 {strides = array<i32>} : memref<1x1xf32, #tpu.memory_space<vmem>>, vector<1x1xf32>,
    } else {
    }
    return
  }
  func.func @transform_0(%arg0: i32) -> (i32, i32) {
    %c0_i32 = arith.constant 0 : i32
    %c0_i32_0 = arith.constant 0 : i32
    return %arg0, %c0_i32 : i32, i32
  }
  func.func @transform_1(%arg0: i32) -> (i32, i32) {
    %c0_i32 = arith.constant 0 : i32
    %c0_i32_0 = arith.constant 0 : i32
    return %arg0, %c0_i32 : i32, i32
  }
  func.func @transform_2(%arg0: i32) -> (i32, i32) {
    %c0_i32 = arith.constant 0 : i32
    %c0_i32_0 = arith.constant 0 : i32
    return %arg0, %c0_i32 : i32, i32
  }
  func.func @transform_3(%arg0: i32) -> (i32, i32) {
    %c0_i32 = arith.constant 0 : i32
    %c0_i32_0 = arith.constant 0 : i32
    %c0_i32_1 = arith.constant 0 : i32
    return %c0_i32, %c0_i32_0 : i32, i32
  }
}

</mosaic_0001>

<bundles_post_ra>
// kernel: tpu_custom_call.1
= control target key start
LH: loop header
LB: loop body
LE: loop exit
PB: predicated region body
PF: predicated region fallthrough
CT: control target
= control target key end

     0   :  { %8 = vsyncpa [#allocation4], 0  ;;  %s244_s0 = inlined_call_operand.hbm [shape: f32[8,128], index: 0, kind: input, shape index: {}]   ;;  %s245_s1 = inlined_call_operand.hbm [shape: f32[8,128], index: 1, kind: input, shape index: {}]   ;;  %s246_s2 = inlined_call_operand.vmem [shape: s8[8,128], index: 2, kind: input, shape index: {}]   ;;  %s247_s3 = inlined_call_operand.hbm [shape: f32[1,1], index: 3, kind: output, shape index: {}]  }
   0x1   :  { %9 = vsyncpa [#allocation7], 0 }
   0x2   :  { %10 = vsyncpa [#allocation5], 0  ;;  %s181_s12 = smov [#allocation3]   ;;  %s182_s14 = smov [#allocation6]  }
   0x3   :  { %s17_s13 = sshll.u32 %s181_s12, 4  ;;  %s27_s15 = sshll.u32 %s182_s14, 4  ;;  %s18_s13 = int_to_ptr.vmem [resolvable:$true] %s17_s13  ;;  %s28_s15 = int_to_ptr.vmem [resolvable:$true] %s27_s15 }
   0x4   :  { %s109_s18 = scalar_lea.hbm %s244_s0, 128 }
   0x5   :  { %p110_p0 = scmp.ne.s32.totalorder %s244_s0, %s109_s18  ;;  %p113_p1 = scmp.lt.u32.totalorder %s109_s18, %s244_s0 }
   0x7   :  { %p115_p2 = pnand %p113_p1, %p110_p0 }
   0x9   :  { %118 = shalt.err (!%p115_p2)
}
   0xa   :  { %s119_s23 = scalar_lea.vmem %s18_s13, 128  ;;  %p124_p4 = scmp.lt.s32.totalorder %s18_s13, %s18_s13 }
   0xb   :  { %p120_p3 = scmp.ne.s32.totalorder %s18_s13, %s119_s23  ;;  %p125_p5 = scmp.lt.s32.totalorder %s119_s23, %s119_s23 }
   0xd   :  { %p126_p6 = por %p125_p5, %p124_p4 }
   0xf   :  { %p127_p7 = pnand %p126_p6, %p120_p3 }
  0x11   :  { %130 = shalt.err (!%p127_p7)
}
  0x12   :  { %20 = dma.hbm_to_vmem [thread:$0]  %s244_s0, 128, %s18_s13, [#allocation4]  }
  0x13   :  { %s131_s28 = scalar_lea.hbm %s245_s1, 128 }
  0x14   :  { %p132_p8 = scmp.ne.s32.totalorder %s245_s1, %s131_s28  ;;  %p135_p9 = scmp.lt.u32.totalorder %s131_s28, %s245_s1 }
  0x16   :  { %p137_p10 = pnand %p135_p9, %p132_p8 }
  0x18   :  { %140 = shalt.err (!%p137_p10)
}
  0x19   :  { %s141_s6 = scalar_lea.vmem %s28_s15, 128  ;;  %p146_p12 = scmp.lt.s32.totalorder %s28_s15, %s28_s15 }
  0x1a   :  { %p142_p11 = scmp.ne.s32.totalorder %s28_s15, %s141_s6  ;;  %p147_p13 = scmp.lt.s32.totalorder %s141_s6, %s141_s6 }
  0x1c   :  { %p148_p0 = por %p147_p13, %p146_p12 }
  0x1e   :  { %p149_p1 = pnand %p148_p0, %p142_p11 }
  0x20   :  { %152 = shalt.err (!%p149_p1)
}
  0x21   :  { %30 = dma.hbm_to_vmem [thread:$0]  %s245_s1, 128, %s28_s15, [#allocation7]  }
  0x22   :  { %175 = dma.done.wait [#allocation4], 128  }
  0x23   :  { %176 = vsyncadd [#allocation4], 4294967168 }
  0x24   :  { %177 = dma.done.wait [#allocation7], 128  }
  0x25   :  { %178 = vsyncadd [#allocation7], 4294967168  ;;  %v183_v0 = vmov 0.0   ;;  %v44_v1 = vld [vmem:[#allocation3] sm:$0xff]  ;;  %v45_v2 = vld [vmem:[#allocation6] sm:$0xff]  ;;  %vm73_vm0 = vcmask 1040384  }
  0x26   :  { %43 = vst [vmem:[#allocation2] sm:$0x1] %v183_v0  ;;  %v46_v3 = vld [vmem:[%s246_s2] sm:$0x3]  ;;  %v49_v5 = vsub.f32 %v45_v2, %v44_v1  ;;  %v54_v6 = vand.u32 2147483647, %v45_v2 }
  0x27   :  { %v47_v4 = vunpack.c.0.s8 %v46_v3  ;;  %s184_s1 = smov [#allocation8]   ;;  %vm85_vm1 = vcmask 0  }
  0x28   :  { %v55_v9 = vadd.f32 1.0, %v54_v6  ;;  %s93_s2 = sshll.u32 %s184_s1, 4  ;;  %s94_s2 = int_to_ptr.vmem [resolvable:$true] %s93_s2 }
  0x29   :  { %v48_v7 = vcvt.s32.f32 %v47_v4  ;;  %s153_s11 = scalar_lea.vmem %s94_s2, 16  ;;  %s157_s12 = scalar_lea.vmem %s94_s2, 32 }
  0x2a   :  { %p154_p2 = scmp.ne.s32.totalorder %s94_s2, %s153_s11  ;;  %p158_p3 = scmp.lt.s32.totalorder %s94_s2, %s94_s2 }
  0x2b   :  { %v50_v8 = vmul.f32 %v49_v5, %v48_v7  ;;  %p159_p4 = scmp.lt.s32.totalorder %s157_s12, %s153_s11 }
  0x2d   :  { %v51_v10 = vand.u32 2147483647, %v50_v8  ;;  %v52_v11 = vmul.f32 %v50_v8, %v50_v8  ;;  %v60_v22 = vld [vmem:[#allocation2] sm:$0x1]  ;;  %p160_p5 = por %p159_p4, %p158_p3 }
  0x2f   :  { %v53_v12 = vmul.f32 %v52_v11, %v51_v10  ;;  %v56_v13 = vmul.f32 %v55_v9, %v51_v10  ;;  %p161_p6 = pnand %p160_p5, %p154_p2 }
  0x31   :  { %v57_v14 = vadd.f32 %v56_v13, %v53_v12 }
  0x33   :  { %v58_v15 = vmul.f32 0.25, %v57_v14 }
  0x35   :  { %v59_v16 = vadd.f32 %v58_v15, %v52_v11 }
  0x37   :  { %v61_v17 = vrot.slane %v59_v16, 4 }
  0x39   :  { %v62_v18 = vadd.f32 %v61_v17, %v59_v16 }
  0x3b   :  { %v63_v19 = vrot.slane %v62_v18, 2 }
  0x3d   :  { %v64_v20 = vadd.f32 %v63_v19, %v62_v18 }
  0x3f   :  { %v65_v21 = vrot.slane %v64_v20, 1 }
  0x41   :  { %v66_v23 = vadd.f32 %v65_v21, %v64_v20 }
  0x43   :  { %v67_v24 = vadd.f32 %v66_v23, %v60_v22 }
  0x45   :  { %68 = vst [vmem:[#allocation2] sm:$0x1] %v67_v24 }
  0x4c   :  { %v72_v25 = vld [vmem:[#allocation2] sm:$0x1] }
  0x4d   :  { %v74_v26 = vsel %vm73_vm0, %v72_v25, 0.0 }
  0x4e   :  { %75 = vadd.xlane.f32.xlu0 %v74_v26 }
  0xdb   :  { %v76_v27 = vpop.xlane.xlu0 %75 }
  0xdc   :  { %v77_v28 = vrot.slane %v76_v27, 4 }
  0xde   :  { %v78_v29 = vadd.f32 %v77_v28, %v76_v27 }
  0xe0   :  { %v79_v30 = vrot.slane %v78_v29, 2 }
  0xe2   :  { %v80_v31 = vadd.f32 %v79_v30, %v78_v29 }
  0xe4   :  { %v81_v32 = vrot.slane %v80_v31, 1 }
  0xe6   :  { %v82_v33 = vadd.f32 %v81_v32, %v80_v31 }
  0xe8   :  { %103 = vpush %v82_v33 }
 0x119   :  { %s104_s10 = spop %103 }
 0x11a   :  { %v84_v34 = vstv %s104_s10 }
 0x11b   :  { %86 = vst.msk [vmem:[#allocation8] sm:$0x1] %vm85_vm1, %v84_v34 }
 0x11c   :  { %164 = shalt.err (!%p161_p6)
}
 0x11d   :  { %s165_s15 = scalar_lea.hbm %s247_s3, 16 }
 0x11e   :  { %p166_p7 = scmp.ne.s32.totalorder %s247_s3, %s165_s15  ;;  %p169_p8 = scmp.lt.u32.totalorder %s165_s15, %s247_s3 }
 0x120   :  { %p171_p9 = pnand %p169_p8, %p166_p7 }
 0x122   :  { %174 = shalt.err (!%p171_p9)
}
 0x123   :  { %96 = dma.vmem_to_hbm [thread:$0]  %s94_s2, 16, %s247_s3, [#allocation5]  }
 0x124   :  { %179 = dma.done.wait [#allocation5], 16  }
 0x125   :  { %180 = vsyncadd [#allocation5], 4294967280 }
 0x126   :  { %100 = vsyncpa [#allocation4], 1 }
 0x127   :  { %101 = vsyncpa [#allocation7], 1 }
 0x128   :  { %102 = vsyncpa [#allocation5], 1 }

</bundles_post_ra>
